<compile_context>
chip_gen: v7x
topology: tpu7x:2x2x1
jax: 0.10.0
libtpu: 0.0.40
codegen_flags: <defaults>
</compile_context>

<pallas_src>
import functools

import jax
import jax.numpy as jnp
from jax import lax
from jax.experimental import pallas as pl
from jax.experimental.pallas import tpu as pltpu


def _round_up(x, m):
    return ((x + m - 1) // m) * m


def _fout_relu_kernel(*refs, keep_threshold, inv_keep, training):
    """Tiled y = dropout(relu(x @ W^T + b)).

    Grid = (M/tm, N/tn, K/tk).  acc_ref (f32 VMEM scratch) accumulates across
    the K (reduction) axis; bias + ReLU + dropout run only on the last K step.
    """
    if training:
        x_ref, w_ref, b_ref, bits_ref, o_ref, acc_ref = refs
    else:
        x_ref, w_ref, b_ref, o_ref, acc_ref = refs
        bits_ref = None

    k = pl.program_id(2)

    @pl.when(k == 0)
    def _init():
        acc_ref[...] = jnp.zeros_like(acc_ref)

    # Weight stays in the PyTorch (out_ch, in_ch) layout: contract dim 1 of
    # both operands so no wrapper-side transpose (extra HBM pass) is needed.
    # TODO(synk): if a bundle dump shows a per-K-step XLU relayout of the
    # (tn, tk) weight tile, pre-transpose the weight once at parameter-setup
    # time and switch to a canonical (M,K)x(K,N) contraction instead.
    acc_ref[...] += lax.dot_general(
        x_ref[...], w_ref[...],
        dimension_numbers=(((1,), (1,)), ((), ())),
        preferred_element_type=jnp.float32,
    )

    @pl.when(k == pl.num_programs(2) - 1)
    def _finalize():
        y = acc_ref[...] + b_ref[...]
        y = jnp.maximum(y, 0.0)
        if training:
            # Inverted dropout: keep iff random int32 >= signed threshold
            # (P(keep) = 1 - p); kept values scaled by 1/(1-p).
            keep = bits_ref[...] >= keep_threshold
            y = jnp.where(keep, y * inv_keep, 0.0)
        o_ref[...] = y.astype(o_ref.dtype)


def fout_relu(x, weight, bias, *, p=0.3, training=False, seed=0,
              tm=None, tn=None, tk=None):
    """x: (B, in_ch) f32; weight: (out_ch, in_ch) f32 (PyTorch layout); bias: (out_ch,)."""
    assert 0.0 <= p < 1.0, "dropout p must be in [0, 1)"
    B, in_ch = x.shape
    out_ch, in_ch_w = weight.shape
    assert in_ch_w == in_ch

    # Tile sizes: sublane-aligned M, lane-dense (>=128) N/K.
    auto_m, auto_n, auto_k = tm is None, tn is None, tk is None
    if auto_m:
        tm = min(_round_up(B, 8), 256)
    if auto_n:
        tn = min(_round_up(out_ch, 128), 512)
    if auto_k:
        tk = min(_round_up(in_ch, 128), 2048)

    # Double-buffered working set (inputs + output) + f32 accumulator.
    def vmem_needed(tm_, tn_, tk_):
        b = 2 * (tm_ * tk_ + tn_ * tk_ + tn_ + tm_ * tn_) * 4
        b += tm_ * tn_ * 4
        if training:
            b += 2 * tm_ * tn_ * 4
        return b

    # Keep the working set under a v7x-safe budget (64 MiB physical there).
    budget = 40 * 1024 * 1024
    while vmem_needed(tm, tn, tk) > budget:
        if auto_k and tk > 512:
            tk //= 2
        elif auto_n and tn > 128:
            tn //= 2
        elif auto_m and tm > 8:
            tm //= 2
        else:
            break

    # v7x megacore: make sure the "parallel" part of the grid has >= 2 blocks
    # when the problem shape allows it (otherwise one TensorCore idles).
    if (_round_up(B, tm) // tm) * (_round_up(out_ch, tn) // tn) < 2:
        if auto_n and tn > 128 and _round_up(out_ch, 128) >= 2 * 128:
            tn = max(128, tn // 2)
        elif auto_m and tm > 8 and _round_up(B, 8) >= 16:
            tm = max(8, tm // 2)

    M = _round_up(B, tm)
    N = _round_up(out_ch, tn)
    K = _round_up(in_ch, tk)

    # Skip padding entirely when already tile-aligned -> no extra per-call
    # HBM read+write pass over the weight / activations.
    x_p = x if (M == B and K == in_ch) else jnp.pad(
        x, ((0, M - B), (0, K - in_ch)))
    w_p = weight if (N == out_ch and K == in_ch) else jnp.pad(
        weight, ((0, N - out_ch), (0, K - in_ch)))
    b_p = (bias if N == out_ch else jnp.pad(bias, (0, N - out_ch))).reshape(1, N)

    grid = (M // tm, N // tn, K // tk)

    in_specs = [
        pl.BlockSpec((tm, tk), lambda i, j, k: (i, k)),   # x tile
        pl.BlockSpec((tn, tk), lambda i, j, k: (j, k)),   # weight tile (native layout)
        pl.BlockSpec((1, tn), lambda i, j, k: (0, j)),    # bias slice
    ]
    inputs = [x_p, w_p, b_p]

    if training:
        # TODO(synk): on real hardware generate these bits in-kernel
        # (pltpu.prng_seed + pltpu.prng_random_bits in the last-K epilogue)
        # to drop this (M, N) uint32 HBM stream; the external path is kept
        # because the stateful TPU PRNG does not lower under the interpret
        # harness.  Mask uses JAX's PRNG (not bit-matching torch) and depends
        # only on `seed`, so vary the seed per call.
        ubits = jax.random.bits(jax.random.PRNGKey(seed), (M, N), jnp.uint32)
        bits_i32 = lax.bitcast_convert_type(ubits, jnp.int32)
        in_specs.append(pl.BlockSpec((tm, tn), lambda i, j, k: (i, j)))
        inputs.append(bits_i32)
        thr = int(round(p * (2 ** 32))) - 2 ** 31          # signed threshold
        thr = max(min(thr, 2 ** 31 - 1), -(2 ** 31))
    else:
        thr = 0

    kernel = functools.partial(
        _fout_relu_kernel,
        keep_threshold=thr,                 # plain Python int -> jaxpr literal
        inv_keep=float(1.0 / (1.0 - p)),    # plain Python float
        training=training,
    )

    flops = 2 * M * N * K
    bytes_accessed = (M * K + N * K + N + M * N) * 4
    if training:
        bytes_accessed += M * N * 4

    vmem_limit = int(min(48 * 1024 * 1024,
                         max(vmem_needed(tm, tn, tk) + 2 * 1024 * 1024,
                             16 * 1024 * 1024)))

    out = pl.pallas_call(
        kernel,
        grid_spec=pltpu.PrefetchScalarGridSpec(
            num_scalar_prefetch=0,
            grid=grid,
            in_specs=in_specs,
            out_specs=pl.BlockSpec((tm, tn), lambda i, j, k: (i, j)),
            scratch_shapes=[pltpu.VMEM((tm, tn), jnp.float32)],
        ),
        out_shape=jax.ShapeDtypeStruct((M, N), x.dtype),
        compiler_params=pltpu.CompilerParams(
            dimension_semantics=("parallel", "parallel", "arbitrary"),
            vmem_limit_bytes=vmem_limit,
        ),
        cost_estimate=pl.CostEstimate(
            flops=flops, transcendentals=0, bytes_accessed=bytes_accessed),
    )(*inputs)

    return out[:B, :out_ch]


if __name__ == "__main__":
    key = jax.random.PRNGKey(0)
    k_x, k_w, k_b = jax.random.split(key, 3)

    B, in_ch, out_ch = 8, 32, 32

    # PyTorch nn.Linear default init: U(-1/sqrt(in_ch), 1/sqrt(in_ch))
    bound = 1.0 / (in_ch ** 0.5)
    weight = jax.random.uniform(k_w, (out_ch, in_ch), jnp.float32, -bound, bound)
    bias = jax.random.uniform(k_b, (out_ch,), jnp.float32, -bound, bound)
    x = jax.random.normal(k_x, (B, in_ch), jnp.float32)

    # Eval mode (dropout = identity): must match the pure-JAX reference.
    y_eval = jax.block_until_ready(fout_relu(x, weight, bias, training=False))
    y_ref = jnp.maximum(x @ weight.T + bias, 0.0)
    assert y_eval.shape == (B, out_ch)
    assert jnp.allclose(y_eval, y_ref, atol=1e-5, rtol=1e-5)

    # Training mode: every element must be either dropped (0) or the reference
    # value scaled by 1/(1-p).
    p = 0.3
    y_train = jax.block_until_ready(
        fout_relu(x, weight, bias, p=p, training=True, seed=123))
    assert y_train.shape == (B, out_ch)
    scaled = y_ref / (1.0 - p)
    ok = jnp.isclose(y_train, 0.0, atol=1e-6) | jnp.isclose(
        y_train, scaled, atol=1e-4, rtol=1e-4)
    assert bool(jnp.all(ok))

    print("KERNEL_OK")
</pallas_src>

<mosaic_0001>
module attributes {stable_mosaic.version = 11 : i64} {
  func.func @_fout_relu_kernel(%arg0: i32, %arg1: i32, %arg2: i32, %arg3: memref<8x128xf32, #tpu.memory_space<vmem>>, %arg4: memref<128x128xf32, #tpu.memory_space<vmem>>, %arg5: memref<1x128xf32, #tpu.memory_space<vmem>>, %arg6: memref<8x128xf32, #tpu.memory_space<vmem>>, %arg7: memref<8x128xf32, #tpu.memory_space<vmem>>) attributes {dimension_semantics = [#tpu.dimension_semantics<parallel>, #tpu.dimension_semantics<parallel>, #tpu.dimension_semantics<arbitrary>], iteration_bounds = array<i64: 1, 1, 1>, scalar_prefetch = 0 : i64, scratch_operands = 1 : i64, tpu.core_type = #tpu.core_type<tc>, window_params = [{transform_indices = @transform_0, window_bounds = array<i64: 8, 128>}, {transform_indices = @transform_1, window_bounds = array<i64: 128, 128>}, {transform_indices = @transform_2, window_bounds = array<i64: 1, 128>}, {transform_indices = @transform_3, window_bounds = array<i64: 8, 128>}]} {
    %c0_i32 = arith.constant 0 : i32
    %0 = arith.cmpi eq, %arg2, %c0_i32 : i32
    %1 = arith.extui %0 : i1 to i32
    %c0_i32_0 = arith.constant 0 : i32
    %2 = arith.cmpi ne, %1, %c0_i32_0 : i32
    scf.if %2 {
      %cst_10 = arith.constant 0.000000e+00 : f32
      %12 = vector.broadcast %cst_10 : f32 to vector<8x128xf32>
      %c0_11 = arith.constant 0 : index
      %c0_12 = arith.constant 0 : index
      %13 = vector.load %arg7[%c0_11, %c0_12] : memref<8x128xf32, #tpu.memory_space<vmem>>, vector<8x128xf32>
      tpu.vector_store %arg7[%c0_11, %c0_12], %12 {strides = array<i32>} : memref<8x128xf32, #tpu.memory_space<vmem>>, vector<8x128xf32>,
    } else {
    }
    %c0 = arith.constant 0 : index
    %c0_1 = arith.constant 0 : index
    %3 = vector.load %arg7[%c0, %c0_1] : memref<8x128xf32, #tpu.memory_space<vmem>>, vector<8x128xf32>
    %c0_2 = arith.constant 0 : index
    %c0_3 = arith.constant 0 : index
    %4 = vector.load %arg3[%c0_2, %c0_3] : memref<8x128xf32, #tpu.memory_space<vmem>>, vector<8x128xf32>
    %c0_4 = arith.constant 0 : index
    %c0_5 = arith.constant 0 : index
    %5 = vector.load %arg4[%c0_4, %c0_5] : memref<128x128xf32, #tpu.memory_space<vmem>>, vector<128x128xf32>
    %cst = arith.constant dense<0.000000e+00> : vector<8x128xf32>
    %6 = tpu.matmul %4, %5, %cst {dimension_numbers = #tpu.dot_dimension_numbers<[1], [1], [0], [0], [0, 0, 1, 0], [], []>} : vector<8x128xf32>, vector<128x128xf32>, vector<8x128xf32> -> vector<8x128xf32>
    %7 = arith.addf %3, %6 : vector<8x128xf32>
    %c0_6 = arith.constant 0 : index
    %c0_7 = arith.constant 0 : index
    %8 = vector.load %arg7[%c0_6, %c0_7] : memref<8x128xf32, #tpu.memory_space<vmem>>, vector<8x128xf32>
    tpu.vector_store %arg7[%c0_6, %c0_7], %7 {strides = array<i32>} : memref<8x128xf32, #tpu.memory_space<vmem>>, vector<8x128xf32>,
    %c0_i32_8 = arith.constant 0 : i32
    %9 = arith.cmpi eq, %arg2, %c0_i32_8 : i32
    %10 = arith.extui %9 : i1 to i32
    %c0_i32_9 = arith.constant 0 : i32
    %11 = arith.cmpi ne, %10, %c0_i32_9 : i32
    scf.if %11 {
      %c0_10 = arith.constant 0 : index
      %c0_11 = arith.constant 0 : index
      %12 = vector.load %arg7[%c0_10, %c0_11] : memref<8x128xf32, #tpu.memory_space<vmem>>, vector<8x128xf32>
      %c0_12 = arith.constant 0 : index
      %c0_13 = arith.constant 0 : index
      %13 = vector.load %arg5[%c0_12, %c0_13] : memref<1x128xf32, #tpu.memory_space<vmem>>, vector<1x128xf32>
      %14 = vector.broadcast %13 : vector<1x128xf32> to vector<8x128xf32>
      %15 = arith.addf %12, %14 : vector<8x128xf32>
      %cst_14 = arith.constant 0.000000e+00 : f32
      %16 = vector.broadcast %cst_14 : f32 to vector<8x128xf32>
      %17 = arith.maximumf %15, %16 : vector<8x128xf32>
      %c0_15 = arith.constant 0 : index
      %c0_16 = arith.constant 0 : index
      %18 = vector.load %arg6[%c0_15, %c0_16] : memref<8x128xf32, #tpu.memory_space<vmem>>, vector<8x128xf32>
      tpu.vector_store %arg6[%c0_15, %c0_16], %17 {strides = array<i32>} : memref<8x128xf32, #tpu.memory_space<vmem>>, vector<8x128xf32>,
    } else {
    }
    return
  }
  func.func @transform_0(%arg0: i32, %arg1: i32, %arg2: i32) -> (i32, i32) {
    %c0_i32 = arith.constant 0 : i32
    return %arg0, %arg2 : i32, i32
  }
  func.func @transform_1(%arg0: i32, %arg1: i32, %arg2: i32) -> (i32, i32) {
    %c0_i32 = arith.constant 0 : i32
    return %arg1, %arg2 : i32, i32
  }
  func.func @transform_2(%arg0: i32, %arg1: i32, %arg2: i32) -> (i32, i32) {
    %c0_i32 = arith.constant 0 : i32
    %c0_i32_0 = arith.constant 0 : i32
    return %c0_i32, %arg1 : i32, i32
  }
  func.func @transform_3(%arg0: i32, %arg1: i32, %arg2: i32) -> (i32, i32) {
    %c0_i32 = arith.constant 0 : i32
    return %arg0, %arg1 : i32, i32
  }
}

</mosaic_0001>

<bundles_post_ra>
// kernel: tpu_custom_call.1
= control target key start
LH: loop header
LB: loop body
LE: loop exit
PB: predicated region body
PF: predicated region fallthrough
CT: control target
= control target key end

     0   :  { %8 = vsyncpa [#allocation4], 0  ;;  %s397_s0 = inlined_call_operand.hbm [shape: f32[8,128], index: 0, kind: input, shape index: {}]   ;;  %s398_s1 = inlined_call_operand.hbm [shape: f32[128,128], index: 1, kind: input, shape index: {}]   ;;  %s399_s2 = inlined_call_operand.vmem [shape: f32[1,128], index: 2, kind: input, shape index: {}]   ;;  %s400_s3 = inlined_call_operand.hbm [shape: f32[8,128], index: 3, kind: output, shape index: {}]  }
   0x1   :  { %9 = vsyncpa [#allocation7], 0 }
   0x2   :  { %10 = vsyncpa [#allocation5], 0  ;;  %s323_s12 = smov [#allocation3]   ;;  %s324_s14 = smov [#allocation6]  }
   0x3   :  { %s17_s13 = sshll.u32 %s323_s12, 4  ;;  %s26_s15 = sshll.u32 %s324_s14, 4  ;;  %s18_s13 = int_to_ptr.vmem [resolvable:$true] %s17_s13  ;;  %s351_s15 = int_to_ptr.vmem [resolvable:$true] %s26_s15 }
   0x4   :  { %s251_s18 = scalar_lea.hbm %s397_s0, 128 }
   0x5   :  { %p252_p0 = scmp.ne.s32.totalorder %s397_s0, %s251_s18  ;;  %p255_p1 = scmp.lt.u32.totalorder %s251_s18, %s397_s0 }
   0x7   :  { %p257_p2 = pnand %p255_p1, %p252_p0 }
   0x9   :  { %260 = shalt.err (!%p257_p2)
}
   0xa   :  { %s261_s23 = scalar_lea.vmem %s18_s13, 128  ;;  %p266_p4 = scmp.lt.s32.totalorder %s18_s13, %s18_s13 }
   0xb   :  { %p262_p3 = scmp.ne.s32.totalorder %s18_s13, %s261_s23  ;;  %p267_p5 = scmp.lt.s32.totalorder %s261_s23, %s261_s23 }
   0xd   :  { %p268_p6 = por %p267_p5, %p266_p4 }
   0xf   :  { %p269_p7 = pnand %p268_p6, %p262_p3 }
  0x11   :  { %272 = shalt.err (!%p269_p7)
}
  0x12   :  { %20 = dma.hbm_to_vmem [thread:$0]  %s397_s0, 128, %s18_s13, [#allocation4]  }
  0x13   :  { %s273_s28 = scalar_lea.hbm %s398_s1, 2048 }
  0x14   :  { %p274_p8 = scmp.ne.s32.totalorder %s398_s1, %s273_s28  ;;  %p277_p9 = scmp.lt.u32.totalorder %s273_s28, %s398_s1 }
  0x16   :  { %p279_p10 = pnand %p277_p9, %p274_p8 }
  0x18   :  { %282 = shalt.err (!%p279_p10)
}
  0x19   :  { %s283_s6 = scalar_lea.vmem %s351_s15, 2048  ;;  %p288_p12 = scmp.lt.s32.totalorder %s351_s15, %s351_s15 }
  0x1a   :  { %p284_p11 = scmp.ne.s32.totalorder %s351_s15, %s283_s6  ;;  %p289_p13 = scmp.lt.s32.totalorder %s283_s6, %s283_s6 }
  0x1c   :  { %p290_p0 = por %p289_p13, %p288_p12 }
  0x1e   :  { %p291_p1 = pnand %p290_p0, %p284_p11 }
  0x20   :  { %294 = shalt.err (!%p291_p1)
}
  0x21   :  { %s325_s0 = smov 128   ;;  %s326_s7 = smov 8  }
  0x22   :  { %32 = dma.hbm_to_vmem [thread:$0]  %s398_s1, 2048, %s351_s15, [#allocation7], %s325_s0, %s325_s0, %s326_s7  }
  0x23   :  { %317 = dma.done.wait [#allocation4], 128  }
  0x24   :  { %318 = vsyncadd [#allocation4], 4294967168 }
  0x25   :  { %319 = dma.done.wait [#allocation7], 2048  }
  0x26   :  { %320 = vsyncadd [#allocation7], 4294965248  ;;  %v327_v0 = vmov 0.0|0.0   ;;  %vm328_vm0 = vmmov 0   ;;  %v329_v1 = vmov 0.0   ;;  %v48_v2 = vld [vmem:[#allocation6] sm:$0xff] }
  0x27   :  { %219 = vmatprep.subr.bf16.mxu0 %v327_v0  ;;  %216 = vmatprep.mubr.msk.f32.mxu0 %vm328_vm0, %v329_v1  ;;  %v49_v3 = vld [vmem:[#allocation6 + $0x8] sm:$0xff]  ;;  %v50_v5 = vld [vmem:[#allocation6 + $0x10] sm:$0xff]  ;;  %v51_v6 = vld [vmem:[#allocation6 + $0x18] sm:$0xff]  ;;  %s330_s11 = smov [#allocation8]  }
  0x28   :  { %v220_v4 = vpack.c.bf16 %v49_v3, %v48_v2  ;;  %v223_v7 = vpack.c.bf16 %v51_v6, %v50_v5  ;;  %v52_v8 = vld [vmem:[#allocation6 + $0x20] sm:$0xff]  ;;  %v53_v9 = vld [vmem:[#allocation6 + $0x28] sm:$0xff]  ;;  %v54_v11 = vld [vmem:[#allocation6 + $0x30] sm:$0xff]  ;;  %s156_s12 = sshll.u32 %s330_s11, 4  ;;  %s157_s12 = int_to_ptr.vmem [resolvable:$true] %s156_s12 }
  0x29   :  { %v226_v10 = vpack.c.bf16 %v53_v9, %v52_v8  ;;  %v55_v12 = vld [vmem:[#allocation6 + $0x38] sm:$0xff]  ;;  %v56_v14 = vld [vmem:[#allocation6 + $0x40] sm:$0xff]  ;;  %v57_v15 = vld [vmem:[#allocation6 + $0x48] sm:$0xff]  ;;  %s295_s13 = scalar_lea.vmem %s157_s12, 128  ;;  %p300_p3 = scmp.lt.s32.totalorder %s157_s12, %s157_s12 }
  0x2a   :  { %221 = vmatpush3.bf16.xpose.msra.mxu0 %v220_v4  ;;  %v229_v13 = vpack.c.bf16 %v55_v12, %v54_v11  ;;  %v232_v16 = vpack.c.bf16 %v57_v15, %v56_v14  ;;  %v58_v17 = vld [vmem:[#allocation6 + $0x50] sm:$0xff]  ;;  %v59_v18 = vld [vmem:[#allocation6 + $0x58] sm:$0xff]  ;;  %v60_v20 = vld [vmem:[#allocation6 + $0x60] sm:$0xff]  ;;  %p296_p2 = scmp.ne.s32.totalorder %s157_s12, %s295_s13  ;;  %p301_p4 = scmp.lt.s32.totalorder %s295_s13, %s295_s13 }
  0x2b   :  { %222 = vmatprep.subr.bf16.mxu0 %v327_v0  ;;  %v235_v19 = vpack.c.bf16 %v59_v18, %v58_v17  ;;  %v61_v21 = vld [vmem:[#allocation6 + $0x68] sm:$0xff]  ;;  %v62_v23 = vld [vmem:[#allocation6 + $0x70] sm:$0xff]  ;;  %v63_v24 = vld [vmem:[#allocation6 + $0x78] sm:$0xff] }
  0x2c   :  { %v238_v22 = vpack.c.bf16 %v61_v21, %v60_v20  ;;  %v241_v25 = vpack.c.bf16 %v63_v24, %v62_v23  ;;  %v47_v26 = vld [vmem:[#allocation3] sm:$0xff]  ;;  %p302_p5 = por %p301_p4, %p300_p3 }
  0x2d   :  { %v166_v27 = vld [vmem:[%s399_s2] ss:$0 sm:$0xff] }
  0x2e   :  { %p303_p6 = pnand %p302_p5, %p296_p2 }
  0x32   :  { %224 = vmatpush3.bf16.xpose.msra.mxu0 %v223_v7 }
  0x33   :  { %225 = vmatprep.subr.bf16.mxu0 %v327_v0 }
  0x3a   :  { %227 = vmatpush3.bf16.xpose.msra.mxu0 %v226_v10 }
  0x3b   :  { %228 = vmatprep.subr.bf16.mxu0 %v327_v0 }
  0x42   :  { %230 = vmatpush3.bf16.xpose.msra.mxu0 %v229_v13 }
  0x43   :  { %231 = vmatprep.subr.bf16.mxu0 %v327_v0 }
  0x4a   :  { %233 = vmatpush3.bf16.xpose.msra.mxu0 %v232_v16 }
  0x4b   :  { %234 = vmatprep.subr.bf16.mxu0 %v327_v0 }
  0x52   :  { %236 = vmatpush3.bf16.xpose.msra.mxu0 %v235_v19 }
  0x53   :  { %237 = vmatprep.subr.bf16.mxu0 %v327_v0 }
  0x5a   :  { %239 = vmatpush3.bf16.xpose.msra.mxu0 %v238_v22 }
  0x5b   :  { %240 = vmatprep.subr.bf16.mxu0 %v327_v0 }
  0x62   :  { %242 = vmatpush3.bf16.xpose.msra.mxu0 %v241_v25 }
  0x69   :  { %217 = vmatmul.mubr.f32.vlgmr.msra.gmra.mrb[0].mxu0 %v47_v26 }
 0x13c   :  { %v130_v28 = vpop.f32.mrb[0].mxu0 }
 0x13d   :  { %v147_v29 = vadd.f32 %v166_v27, %v130_v28  ;;  %v218_v30 = vpop.f32.mrb[1].mxu0 }
 0x13f   :  { %v148_v31 = vmax.f32 %v147_v29, 0.0 }
 0x141   :  { %149 = vst [vmem:[#allocation8] sm:$0xff] %v148_v31 }
 0x142   :  { %306 = shalt.err (!%p303_p6)
}
 0x143   :  { %s307_s16 = scalar_lea.hbm %s400_s3, 128 }
 0x144   :  { %p308_p7 = scmp.ne.s32.totalorder %s400_s3, %s307_s16  ;;  %p311_p8 = scmp.lt.u32.totalorder %s307_s16, %s400_s3 }
 0x146   :  { %p313_p9 = pnand %p311_p8, %p308_p7 }
 0x148   :  { %316 = shalt.err (!%p313_p9)
}
 0x149   :  { %159 = dma.vmem_to_hbm [thread:$0]  %s157_s12, 128, %s400_s3, [#allocation5]  }
 0x14a   :  { %321 = dma.done.wait [#allocation5], 128  }
 0x14b   :  { %322 = vsyncadd [#allocation5], 4294967168 }
 0x14c   :  { %163 = vsyncpa [#allocation4], 1 }
 0x14d   :  { %164 = vsyncpa [#allocation7], 1 }
 0x14e   :  { %165 = vsyncpa [#allocation5], 1 }

</bundles_post_ra>
